<compile_context>
chip_gen: v7x
topology: tpu7x:2x2x1
jax: 0.10.0
libtpu: 0.0.40
codegen_flags: <defaults>
</compile_context>

<pallas_src>
import jax
import jax.numpy as jnp
from jax.experimental import pallas as pl
from jax.experimental.pallas import tpu as pltpu

# ----------------------------- model config -----------------------------
SEQ_LEN = 8
INPUT_SIZE = 1
HIDDEN = 32
N_LAYERS = 2          # hard-wired to 2 layers in the kernel (module default)
N_CLASSES = 1
BATCH = 2


# ------------------------------- kernel ---------------------------------
def rnn_kernel(xproj_ref,       # (T, B, H) f32 : x@Wih0^T + bih0 + bhh0 (hoisted)
               wrec_ref,        # (3H, H) bf16  : [Whh0^T ; Wih1^T ; Whh1^T]
               b1_ref,          # (1, H) f32    : bih1 + bhh1
               wfc_ref,         # (T*H, C) bf16 : fc weight, transposed
               bfc_ref,         # (1, C) f32
               out_ref,         # (B, C) f32
               hist_ref):       # scratch (B, T*H) f32 : per-step h1 history
    T, B, H = xproj_ref.shape

    # Static slices of the packed recurrent weights (zero runtime cost).
    w_hh0 = wrec_ref[0:H, :]            # (H, H)   layer-0 recurrent
    w_l1 = wrec_ref[H:3 * H, :]         # (2H, H)  layer-1 [input ; recurrent] merged
    b1 = jnp.broadcast_to(b1_ref[...], (B, H))   # hoisted broadcast (not re-done per step)

    h0 = jnp.zeros((B, H), jnp.float32)
    h1 = jnp.zeros((B, H), jnp.float32)

    # T is static -> fully unrolled; scheduler can overlap t and t+1 chains.
    for t in range(T):
        # layer 0: h0 = tanh(xproj[t] + h0 @ Whh0^T)   (biases already in xproj)
        pre0 = xproj_ref[t] + jnp.dot(h0.astype(jnp.bfloat16), w_hh0,
                                      preferred_element_type=jnp.float32)
        h0 = jnp.tanh(pre0)

        # layer 1: h1 = tanh([h0, h1] @ [Wih1^T; Whh1^T] + (bih1 + bhh1))
        hcat = jnp.concatenate([h0, h1], axis=-1).astype(jnp.bfloat16)    # (B, 2H)
        h1 = jnp.tanh(b1 + jnp.dot(hcat, w_l1,
                                   preferred_element_type=jnp.float32))

        hist_ref[:, t * H:(t + 1) * H] = h1        # static-offset store

    # fc pulled out of the recurrence: one (B, T*H) @ (T*H, C) matmul.
    h_all = hist_ref[...].astype(jnp.bfloat16)
    out_ref[...] = (jnp.dot(h_all, wfc_ref[...],
                            preferred_element_type=jnp.float32)
                    + bfc_ref[...])


# ------------------------------- wrapper ---------------------------------
def rnn_forward(x, params):
    """x: (B, T, I) float32.  Returns (B, n_classes) float32."""
    B, T, I = x.shape
    H = params["whh0"].shape[0]
    C = params["bfc"].shape[0]

    x_f32 = x.astype(jnp.float32)

    # Hoisted input projection (no dependence on the hidden state):
    #   xproj[t, b, :] = x[b, t, :] @ Wih0^T + bih0 + bhh0
    xproj = (jnp.einsum("bti,hi->tbh", x_f32, params["wih0"].astype(jnp.float32))
             + (params["bih0"] + params["bhh0"])[None, None, :]).astype(jnp.float32)

    # Packed recurrent weights (pre-transposed): rows [0:H]=Whh0^T,
    # [H:2H]=Wih1^T, [2H:3H]=Whh1^T.  bf16 for MXU, f32 accumulation in-kernel.
    wrec = jnp.concatenate(
        [params["whh0"].T, params["wih1"].T, params["whh1"].T], axis=0
    ).astype(jnp.bfloat16)                                              # (3H, H)
    b1 = (params["bih1"] + params["bhh1"]).reshape(1, H).astype(jnp.float32)

    # PyTorch fc acts on out.reshape(B, T*H) with (t, h) row-major flattening,
    # which matches writing h1_t at columns [t*H:(t+1)*H] of the history.
    wfc = params["wfc"].T.astype(jnp.bfloat16)                          # (T*H, C)
    bfc = params["bfc"].reshape(1, C).astype(jnp.float32)

    vmem = pl.BlockSpec(memory_space=pltpu.MemorySpace.VMEM)
    out = pl.pallas_call(
        rnn_kernel,
        out_shape=jax.ShapeDtypeStruct((B, C), jnp.float32),
        in_specs=[vmem] * 5,
        out_specs=vmem,
        scratch_shapes=[pltpu.VMEM((B, T * H), jnp.float32)],
    )(xproj, wrec, b1, wfc, bfc)
    return out
    # TODO(synk): for real workloads with large batch, add a grid axis over B
    # with dimension_semantics=("parallel",) to use both v7x TensorCores.


# --------------------------- pure-JAX reference ---------------------------
def rnn_reference(x, p):
    B, T, _ = x.shape
    H = p["whh0"].shape[0]
    h0 = jnp.zeros((B, H), jnp.float32)
    h1 = jnp.zeros((B, H), jnp.float32)
    outs = []
    for t in range(T):
        xt = x[:, t, :]
        h0 = jnp.tanh(xt @ p["wih0"].T + p["bih0"] + h0 @ p["whh0"].T + p["bhh0"])
        h1 = jnp.tanh(h0 @ p["wih1"].T + p["bih1"] + h1 @ p["whh1"].T + p["bhh1"])
        outs.append(h1)
    out = jnp.stack(outs, axis=1).reshape(B, -1)                        # (B, T*H)
    return out @ p["wfc"].T + p["bfc"]


# ----------------------------- param init --------------------------------
def init_params(key):
    """Deterministic init matching PyTorch shapes (U(-1/sqrt(H), 1/sqrt(H)))."""
    k = 1.0 / jnp.sqrt(jnp.float32(HIDDEN))
    keys = jax.random.split(key, 10)
    u = lambda kk, shape: jax.random.uniform(kk, shape, jnp.float32, -k, k)
    return {
        "wih0": u(keys[0], (HIDDEN, INPUT_SIZE)),
        "whh0": u(keys[1], (HIDDEN, HIDDEN)),
        "bih0": u(keys[2], (HIDDEN,)),
        "bhh0": u(keys[3], (HIDDEN,)),
        "wih1": u(keys[4], (HIDDEN, HIDDEN)),
        "whh1": u(keys[5], (HIDDEN, HIDDEN)),
        "bih1": u(keys[6], (HIDDEN,)),
        "bhh1": u(keys[7], (HIDDEN,)),
        "wfc":  u(keys[8], (N_CLASSES, HIDDEN * SEQ_LEN)),
        "bfc":  u(keys[9], (N_CLASSES,)),
    }


if __name__ == "__main__":
    key = jax.random.PRNGKey(0)
    kx, kp = jax.random.split(key)
    x = jax.random.normal(kx, (BATCH, SEQ_LEN, INPUT_SIZE), jnp.float32)
    params = init_params(kp)

    out = rnn_forward(x, params)
    out = jax.block_until_ready(out)

    ref = rnn_reference(x, params)
    assert out.shape == (BATCH, N_CLASSES)
    # Tolerance relaxed vs the pure-f32 version: MXU operands are bf16
    # (f32 accumulation), per the performance review.
    assert jnp.allclose(out, ref, atol=3e-2, rtol=3e-2), (out, ref)
    print("KERNEL_OK")
</pallas_src>

<mosaic_0001>
module attributes {stable_mosaic.version = 11 : i64} {
  func.func @rnn_kernel(%arg0: memref<8x2x32xf32, #tpu.memory_space<vmem>>, %arg1: memref<96x32xbf16, #tpu.memory_space<vmem>>, %arg2: memref<1x32xf32, #tpu.memory_space<vmem>>, %arg3: memref<256x1xbf16, #tpu.memory_space<vmem>>, %arg4: memref<1x1xf32, #tpu.memory_space<vmem>>, %arg5: memref<2x1xf32, #tpu.memory_space<vmem>>, %arg6: memref<2x256xf32, #tpu.memory_space<vmem>>) attributes {dimension_semantics = [], scalar_prefetch = 0 : i64, scratch_operands = 1 : i64, tpu.core_type = #tpu.core_type<tc>} {
    %c0 = arith.constant 0 : index
    %c0_0 = arith.constant 0 : index
    %0 = vector.load %arg1[%c0, %c0_0] : memref<96x32xbf16, #tpu.memory_space<vmem>>, vector<32x32xbf16>
    %c32 = arith.constant 32 : index
    %c0_1 = arith.constant 0 : index
    %1 = vector.load %arg1[%c32, %c0_1] : memref<96x32xbf16, #tpu.memory_space<vmem>>, vector<64x32xbf16>
    %c0_2 = arith.constant 0 : index
    %c0_3 = arith.constant 0 : index
    %2 = vector.load %arg2[%c0_2, %c0_3] : memref<1x32xf32, #tpu.memory_space<vmem>>, vector<1x32xf32>
    %3 = vector.shape_cast %2 : vector<1x32xf32> to vector<1x32xf32>
    %4 = vector.broadcast %3 : vector<1x32xf32> to vector<2x32xf32>
    %cst = arith.constant 0.000000e+00 : f32
    %5 = vector.broadcast %cst : f32 to vector<2x32xf32>
    %cst_4 = arith.constant 0.000000e+00 : f32
    %6 = vector.broadcast %cst_4 : f32 to vector<2x32xf32>
    %c0_5 = arith.constant 0 : index
    %c0_6 = arith.constant 0 : index
    %c0_7 = arith.constant 0 : index
    %7 = vector.load %arg0[%c0_5, %c0_6, %c0_7] : memref<8x2x32xf32, #tpu.memory_space<vmem>>, vector<1x2x32xf32>
    %8 = vector.shape_cast %7 : vector<1x2x32xf32> to vector<2x32xf32>
    %9 = arith.truncf %5 : vector<2x32xf32> to vector<2x32xbf16>
    %cst_8 = arith.constant dense<0.000000e+00> : vector<2x32xf32>
    %10 = tpu.matmul %9, %0, %cst_8 {dimension_numbers = #tpu.dot_dimension_numbers<[1], [0], [0], [1], [0, 0, 1, 1], [], []>} : vector<2x32xbf16>, vector<32x32xbf16>, vector<2x32xf32> -> vector<2x32xf32>
    %11 = arith.addf %8, %10 : vector<2x32xf32>
    %12 = math.tanh %11 : vector<2x32xf32>
    %13 = tpu.concatenate %12, %6 in 1 : vector<2x32xf32>, vector<2x32xf32> -> vector<2x64xf32>
    %14 = arith.truncf %13 : vector<2x64xf32> to vector<2x64xbf16>
    %cst_9 = arith.constant dense<0.000000e+00> : vector<2x32xf32>
    %15 = tpu.matmul %14, %1, %cst_9 {dimension_numbers = #tpu.dot_dimension_numbers<[1], [0], [0], [1], [0, 0, 1, 1], [], []>} : vector<2x64xbf16>, vector<64x32xbf16>, vector<2x32xf32> -> vector<2x32xf32>
    %16 = arith.addf %4, %15 : vector<2x32xf32>
    %17 = math.tanh %16 : vector<2x32xf32>
    %c0_10 = arith.constant 0 : index
    %c0_11 = arith.constant 0 : index
    %18 = vector.load %arg6[%c0_10, %c0_11] : memref<2x256xf32, #tpu.memory_space<vmem>>, vector<2x32xf32>
    tpu.vector_store %arg6[%c0_10, %c0_11], %17 {strides = array<i32>} : memref<2x256xf32, #tpu.memory_space<vmem>>, vector<2x32xf32>,
    %c1 = arith.constant 1 : index
    %c0_12 = arith.constant 0 : index
    %c0_13 = arith.constant 0 : index
    %19 = vector.load %arg0[%c1, %c0_12, %c0_13] : memref<8x2x32xf32, #tpu.memory_space<vmem>>, vector<1x2x32xf32>
    %20 = vector.shape_cast %19 : vector<1x2x32xf32> to vector<2x32xf32>
    %21 = arith.truncf %12 : vector<2x32xf32> to vector<2x32xbf16>
    %cst_14 = arith.constant dense<0.000000e+00> : vector<2x32xf32>
    %22 = tpu.matmul %21, %0, %cst_14 {dimension_numbers = #tpu.dot_dimension_numbers<[1], [0], [0], [1], [0, 0, 1, 1], [], []>} : vector<2x32xbf16>, vector<32x32xbf16>, vector<2x32xf32> -> vector<2x32xf32>
    %23 = arith.addf %20, %22 : vector<2x32xf32>
    %24 = math.tanh %23 : vector<2x32xf32>
    %25 = tpu.concatenate %24, %17 in 1 : vector<2x32xf32>, vector<2x32xf32> -> vector<2x64xf32>
    %26 = arith.truncf %25 : vector<2x64xf32> to vector<2x64xbf16>
    %cst_15 = arith.constant dense<0.000000e+00> : vector<2x32xf32>
    %27 = tpu.matmul %26, %1, %cst_15 {dimension_numbers = #tpu.dot_dimension_numbers<[1], [0], [0], [1], [0, 0, 1, 1], [], []>} : vector<2x64xbf16>, vector<64x32xbf16>, vector<2x32xf32> -> vector<2x32xf32>
    %28 = arith.addf %4, %27 : vector<2x32xf32>
    %29 = math.tanh %28 : vector<2x32xf32>
    %c0_16 = arith.constant 0 : index
    %c32_17 = arith.constant 32 : index
    %30 = vector.load %arg6[%c0_16, %c32_17] : memref<2x256xf32, #tpu.memory_space<vmem>>, vector<2x32xf32>
    tpu.vector_store %arg6[%c0_16, %c32_17], %29 {strides = array<i32>} : memref<2x256xf32, #tpu.memory_space<vmem>>, vector<2x32xf32>,
    %c2 = arith.constant 2 : index
    %c0_18 = arith.constant 0 : index
    %c0_19 = arith.constant 0 : index
    %31 = vector.load %arg0[%c2, %c0_18, %c0_19] : memref<8x2x32xf32, #tpu.memory_space<vmem>>, vector<1x2x32xf32>
    %32 = vector.shape_cast %31 : vector<1x2x32xf32> to vector<2x32xf32>
    %33 = arith.truncf %24 : vector<2x32xf32> to vector<2x32xbf16>
    %cst_20 = arith.constant dense<0.000000e+00> : vector<2x32xf32>
    %34 = tpu.matmul %33, %0, %cst_20 {dimension_numbers = #tpu.dot_dimension_numbers<[1], [0], [0], [1], [0, 0, 1, 1], [], []>} : vector<2x32xbf16>, vector<32x32xbf16>, vector<2x32xf32> -> vector<2x32xf32>
    %35 = arith.addf %32, %34 : vector<2x32xf32>
    %36 = math.tanh %35 : vector<2x32xf32>
    %37 = tpu.concatenate %36, %29 in 1 : vector<2x32xf32>, vector<2x32xf32> -> vector<2x64xf32>
    %38 = arith.truncf %37 : vector<2x64xf32> to vector<2x64xbf16>
    %cst_21 = arith.constant dense<0.000000e+00> : vector<2x32xf32>
    %39 = tpu.matmul %38, %1, %cst_21 {dimension_numbers = #tpu.dot_dimension_numbers<[1], [0], [0], [1], [0, 0, 1, 1], [], []>} : vector<2x64xbf16>, vector<64x32xbf16>, vector<2x32xf32> -> vector<2x32xf32>
    %40 = arith.addf %4, %39 : vector<2x32xf32>
    %41 = math.tanh %40 : vector<2x32xf32>
    %c0_22 = arith.constant 0 : index
    %c64 = arith.constant 64 : index
    %42 = vector.load %arg6[%c0_22, %c64] : memref<2x256xf32, #tpu.memory_space<vmem>>, vector<2x32xf32>
    tpu.vector_store %arg6[%c0_22, %c64], %41 {strides = array<i32>} : memref<2x256xf32, #tpu.memory_space<vmem>>, vector<2x32xf32>,
    %c3 = arith.constant 3 : index
    %c0_23 = arith.constant 0 : index
    %c0_24 = arith.constant 0 : index
    %43 = vector.load %arg0[%c3, %c0_23, %c0_24] : memref<8x2x32xf32, #tpu.memory_space<vmem>>, vector<1x2x32xf32>
    %44 = vector.shape_cast %43 : vector<1x2x32xf32> to vector<2x32xf32>
    %45 = arith.truncf %36 : vector<2x32xf32> to vector<2x32xbf16>
    %cst_25 = arith.constant dense<0.000000e+00> : vector<2x32xf32>
    %46 = tpu.matmul %45, %0, %cst_25 {dimension_numbers = #tpu.dot_dimension_numbers<[1], [0], [0], [1], [0, 0, 1, 1], [], []>} : vector<2x32xbf16>, vector<32x32xbf16>, vector<2x32xf32> -> vector<2x32xf32>
    %47 = arith.addf %44, %46 : vector<2x32xf32>
    %48 = math.tanh %47 : vector<2x32xf32>
    %49 = tpu.concatenate %48, %41 in 1 : vector<2x32xf32>, vector<2x32xf32> -> vector<2x64xf32>
    %50 = arith.truncf %49 : vector<2x64xf32> to vector<2x64xbf16>
    %cst_26 = arith.constant dense<0.000000e+00> : vector<2x32xf32>
    %51 = tpu.matmul %50, %1, %cst_26 {dimension_numbers = #tpu.dot_dimension_numbers<[1], [0], [0], [1], [0, 0, 1, 1], [], []>} : vector<2x64xbf16>, vector<64x32xbf16>, vector<2x32xf32> -> vector<2x32xf32>
    %52 = arith.addf %4, %51 : vector<2x32xf32>
    %53 = math.tanh %52 : vector<2x32xf32>
    %c0_27 = arith.constant 0 : index
    %c96 = arith.constant 96 : index
    %54 = vector.load %arg6[%c0_27, %c96] : memref<2x256xf32, #tpu.memory_space<vmem>>, vector<2x32xf32>
    tpu.vector_store %arg6[%c0_27, %c96], %53 {strides = array<i32>} : memref<2x256xf32, #tpu.memory_space<vmem>>, vector<2x32xf32>,
    %c4 = arith.constant 4 : index
    %c0_28 = arith.constant 0 : index
    %c0_29 = arith.constant 0 : index
    %55 = vector.load %arg0[%c4, %c0_28, %c0_29] : memref<8x2x32xf32, #tpu.memory_space<vmem>>, vector<1x2x32xf32>
    %56 = vector.shape_cast %55 : vector<1x2x32xf32> to vector<2x32xf32>
    %57 = arith.truncf %48 : vector<2x32xf32> to vector<2x32xbf16>
    %cst_30 = arith.constant dense<0.000000e+00> : vector<2x32xf32>
    %58 = tpu.matmul %57, %0, %cst_30 {dimension_numbers = #tpu.dot_dimension_numbers<[1], [0], [0], [1], [0, 0, 1, 1], [], []>} : vector<2x32xbf16>, vector<32x32xbf16>, vector<2x32xf32> -> vector<2x32xf32>
    %59 = arith.addf %56, %58 : vector<2x32xf32>
    %60 = math.tanh %59 : vector<2x32xf32>
    %61 = tpu.concatenate %60, %53 in 1 : vector<2x32xf32>, vector<2x32xf32> -> vector<2x64xf32>
    %62 = arith.truncf %61 : vector<2x64xf32> to vector<2x64xbf16>
    %cst_31 = arith.constant dense<0.000000e+00> : vector<2x32xf32>
    %63 = tpu.matmul %62, %1, %cst_31 {dimension_numbers = #tpu.dot_dimension_numbers<[1], [0], [0], [1], [0, 0, 1, 1], [], []>} : vector<2x64xbf16>, vector<64x32xbf16>, vector<2x32xf32> -> vector<2x32xf32>
    %64 = arith.addf %4, %63 : vector<2x32xf32>
    %65 = math.tanh %64 : vector<2x32xf32>
    %c0_32 = arith.constant 0 : index
    %c128 = arith.constant 128 : index
    %66 = vector.load %arg6[%c0_32, %c128] : memref<2x256xf32, #tpu.memory_space<vmem>>, vector<2x32xf32>
    tpu.vector_store %arg6[%c0_32, %c128], %65 {strides = array<i32>} : memref<2x256xf32, #tpu.memory_space<vmem>>, vector<2x32xf32>,
    %c5 = arith.constant 5 : index
    %c0_33 = arith.constant 0 : index
    %c0_34 = arith.constant 0 : index
    %67 = vector.load %arg0[%c5, %c0_33, %c0_34] : memref<8x2x32xf32, #tpu.memory_space<vmem>>, vector<1x2x32xf32>
    %68 = vector.shape_cast %67 : vector<1x2x32xf32> to vector<2x32xf32>
    %69 = arith.truncf %60 : vector<2x32xf32> to vector<2x32xbf16>
    %cst_35 = arith.constant dense<0.000000e+00> : vector<2x32xf32>
    %70 = tpu.matmul %69, %0, %cst_35 {dimension_numbers = #tpu.dot_dimension_numbers<[1], [0], [0], [1], [0, 0, 1, 1], [], []>} : vector<2x32xbf16>, vector<32x32xbf16>, vector<2x32xf32> -> vector<2x32xf32>
    %71 = arith.addf %68, %70 : vector<2x32xf32>
    %72 = math.tanh %71 : vector<2x32xf32>
    %73 = tpu.concatenate %72, %65 in 1 : vector<2x32xf32>, vector<2x32xf32> -> vector<2x64xf32>
    %74 = arith.truncf %73 : vector<2x64xf32> to vector<2x64xbf16>
    %cst_36 = arith.constant dense<0.000000e+00> : vector<2x32xf32>
    %75 = tpu.matmul %74, %1, %cst_36 {dimension_numbers = #tpu.dot_dimension_numbers<[1], [0], [0], [1], [0, 0, 1, 1], [], []>} : vector<2x64xbf16>, vector<64x32xbf16>, vector<2x32xf32> -> vector<2x32xf32>
    %76 = arith.addf %4, %75 : vector<2x32xf32>
    %77 = math.tanh %76 : vector<2x32xf32>
    %c0_37 = arith.constant 0 : index
    %c160 = arith.constant 160 : index
    %78 = vector.load %arg6[%c0_37, %c160] : memref<2x256xf32, #tpu.memory_space<vmem>>, vector<2x32xf32>
    tpu.vector_store %arg6[%c0_37, %c160], %77 {strides = array<i32>} : memref<2x256xf32, #tpu.memory_space<vmem>>, vector<2x32xf32>,
    %c6 = arith.constant 6 : index
    %c0_38 = arith.constant 0 : index
    %c0_39 = arith.constant 0 : index
    %79 = vector.load %arg0[%c6, %c0_38, %c0_39] : memref<8x2x32xf32, #tpu.memory_space<vmem>>, vector<1x2x32xf32>
    %80 = vector.shape_cast %79 : vector<1x2x32xf32> to vector<2x32xf32>
    %81 = arith.truncf %72 : vector<2x32xf32> to vector<2x32xbf16>
    %cst_40 = arith.constant dense<0.000000e+00> : vector<2x32xf32>
    %82 = tpu.matmul %81, %0, %cst_40 {dimension_numbers = #tpu.dot_dimension_numbers<[1], [0], [0], [1], [0, 0, 1, 1], [], []>} : vector<2x32xbf16>, vector<32x32xbf16>, vector<2x32xf32> -> vector<2x32xf32>
    %83 = arith.addf %80, %82 : vector<2x32xf32>
    %84 = math.tanh %83 : vector<2x32xf32>
    %85 = tpu.concatenate %84, %77 in 1 : vector<2x32xf32>, vector<2x32xf32> -> vector<2x64xf32>
    %86 = arith.truncf %85 : vector<2x64xf32> to vector<2x64xbf16>
    %cst_41 = arith.constant dense<0.000000e+00> : vector<2x32xf32>
    %87 = tpu.matmul %86, %1, %cst_41 {dimension_numbers = #tpu.dot_dimension_numbers<[1], [0], [0], [1], [0, 0, 1, 1], [], []>} : vector<2x64xbf16>, vector<64x32xbf16>, vector<2x32xf32> -> vector<2x32xf32>
    %88 = arith.addf %4, %87 : vector<2x32xf32>
    %89 = math.tanh %88 : vector<2x32xf32>
    %c0_42 = arith.constant 0 : index
    %c192 = arith.constant 192 : index
    %90 = vector.load %arg6[%c0_42, %c192] : memref<2x256xf32, #tpu.memory_space<vmem>>, vector<2x32xf32>
    tpu.vector_store %arg6[%c0_42, %c192], %89 {strides = array<i32>} : memref<2x256xf32, #tpu.memory_space<vmem>>, vector<2x32xf32>,
    %c7 = arith.constant 7 : index
    %c0_43 = arith.constant 0 : index
    %c0_44 = arith.constant 0 : index
    %91 = vector.load %arg0[%c7, %c0_43, %c0_44] : memref<8x2x32xf32, #tpu.memory_space<vmem>>, vector<1x2x32xf32>
    %92 = vector.shape_cast %91 : vector<1x2x32xf32> to vector<2x32xf32>
    %93 = arith.truncf %84 : vector<2x32xf32> to vector<2x32xbf16>
    %cst_45 = arith.constant dense<0.000000e+00> : vector<2x32xf32>
    %94 = tpu.matmul %93, %0, %cst_45 {dimension_numbers = #tpu.dot_dimension_numbers<[1], [0], [0], [1], [0, 0, 1, 1], [], []>} : vector<2x32xbf16>, vector<32x32xbf16>, vector<2x32xf32> -> vector<2x32xf32>
    %95 = arith.addf %92, %94 : vector<2x32xf32>
    %96 = math.tanh %95 : vector<2x32xf32>
    %97 = tpu.concatenate %96, %89 in 1 : vector<2x32xf32>, vector<2x32xf32> -> vector<2x64xf32>
    %98 = arith.truncf %97 : vector<2x64xf32> to vector<2x64xbf16>
    %cst_46 = arith.constant dense<0.000000e+00> : vector<2x32xf32>
    %99 = tpu.matmul %98, %1, %cst_46 {dimension_numbers = #tpu.dot_dimension_numbers<[1], [0], [0], [1], [0, 0, 1, 1], [], []>} : vector<2x64xbf16>, vector<64x32xbf16>, vector<2x32xf32> -> vector<2x32xf32>
    %100 = arith.addf %4, %99 : vector<2x32xf32>
    %101 = math.tanh %100 : vector<2x32xf32>
    %c0_47 = arith.constant 0 : index
    %c224 = arith.constant 224 : index
    %102 = vector.load %arg6[%c0_47, %c224] : memref<2x256xf32, #tpu.memory_space<vmem>>, vector<2x32xf32>
    tpu.vector_store %arg6[%c0_47, %c224], %101 {strides = array<i32>} : memref<2x256xf32, #tpu.memory_space<vmem>>, vector<2x32xf32>,
    %c0_48 = arith.constant 0 : index
    %c0_49 = arith.constant 0 : index
    %103 = vector.load %arg6[%c0_48, %c0_49] : memref<2x256xf32, #tpu.memory_space<vmem>>, vector<2x256xf32>
    %104 = arith.truncf %103 : vector<2x256xf32> to vector<2x256xbf16>
    %c0_50 = arith.constant 0 : index
    %c0_51 = arith.constant 0 : index
    %105 = vector.load %arg3[%c0_50, %c0_51] : memref<256x1xbf16, #tpu.memory_space<vmem>>, vector<256x1xbf16>
    %cst_52 = arith.constant dense<0.000000e+00> : vector<2x1xf32>
    %106 = tpu.matmul %104, %105, %cst_52 {dimension_numbers = #tpu.dot_dimension_numbers<[1], [0], [0], [1], [0, 0, 1, 1], [], []>} : vector<2x256xbf16>, vector<256x1xbf16>, vector<2x1xf32> -> vector<2x1xf32>
    %c0_53 = arith.constant 0 : index
    %c0_54 = arith.constant 0 : index
    %107 = vector.load %arg4[%c0_53, %c0_54] : memref<1x1xf32, #tpu.memory_space<vmem>>, vector<1x1xf32>
    %108 = vector.broadcast %107 : vector<1x1xf32> to vector<2x1xf32>
    %109 = arith.addf %106, %108 : vector<2x1xf32>
    %c0_55 = arith.constant 0 : index
    %c0_56 = arith.constant 0 : index
    %110 = vector.load %arg5[%c0_55, %c0_56] : memref<2x1xf32, #tpu.memory_space<vmem>>, vector<2x1xf32>
    tpu.vector_store %arg5[%c0_55, %c0_56], %109 {strides = array<i32>} : memref<2x1xf32, #tpu.memory_space<vmem>>, vector<2x1xf32>,
    return
  }
}

</mosaic_0001>

<bundles_post_ra>
// kernel: tpu_custom_call.1
= control target key start
LH: loop header
LB: loop body
LE: loop exit
PB: predicated region body
PF: predicated region fallthrough
CT: control target
= control target key end

     0   :  { %v1488_v0 = vmov 0.0   ;;  %vm1489_vm0 = vmmov 0   ;;  %v1490_v3 = vmov 0   ;;  %vm55_vm1 = vcmask 261120   ;;  %s1491_s8 = smov 32   ;;  %s1493_s20 = smov 64   ;;  %s1836_s1 = inlined_call_operand.vmem [shape: bf16[96,32], index: 1, kind: input, shape index: {}]   ;;  %s1837_s0 = inlined_call_operand.vmem [shape: f32[8,2,32], index: 0, kind: input, shape index: {}]   ;;  %s1838_s2 = inlined_call_operand.vmem [shape: f32[1,32], index: 2, kind: input, shape index: {}]   ;;  %s1839_s3 = inlined_call_operand.vmem [shape: bf16[256,1], index: 3, kind: input, shape index: {}]   ;;  %s1840_s4 = inlined_call_operand.<no memory space> [shape: f32[1,1], index: 4, kind: input, shape index: {}]   ;;  %s1841_s5 = inlined_call_operand.vmem [shape: f32[2,1], index: 5, kind: output, shape index: {}]  }
   0x1   :  { %1267 = vmatprep.subr.bf16.mxu0 %v1488_v0  ;;  %v1529_v1 = vld [vmem:[%s1836_s1] sm:$0xff]   ;;  %1271 = vmatprep.mubr.msk.bf16.mxu0 %vm1489_vm0, %v1488_v0  ;;  %v1540_v2 = vld [vmem:[%s1836_s1 + $0x8] sm:$0xff]   ;;  %v1554_v4 = vld [vmem:[%s1836_s1 + $0x10] sm:$0xff]   ;;  %vm127_vm2 = vcmask 523264   ;;  %vm173_vm3 = vcmask 254976   ;;  %s1494_s21 = smov 96  }
   0x2   :  { %1275 = vmatprep.subr.bf16.mxu1 %v1488_v0  ;;  %1283 = vmatprep.mubr.msk.bf16.mxu1 %vm1489_vm0, %v1488_v0  ;;  %v1561_v5 = vld [vmem:[%s1836_s1 + $0x18] sm:$0xff]   ;;  %v1567_v6 = vld [vmem:[%s1836_s1 + $0x20] sm:$0xff]   ;;  %v1574_v7 = vld [vmem:[%s1836_s1 + $0x28] sm:$0xff]   ;;  %vm285_vm4 = vcmask 517376   ;;  %vm396_vm5 = vcmask 779776   ;;  %vm507_vm6 = vcmask 1042176  }
   0x3   :  { %1268 = vmatpush3.bf16.msra.mxu0 %v1529_v1  ;;  %1276 = vmatpush3.bf16.msra.mxu1 %v1554_v4  ;;  %v42_v8 = vld [vmem:[%s1837_s0] sm:$0x3]  ;;  %v1142_v29 = vld [vmem:[%s1837_s0 + $0x2] sm:$0x3]  ;;  %v1145_v41 = vld [vmem:[%s1837_s0 + $0x4] sm:$0x3] }
   0x4   :  { %1269 = vmatprep.subr.bf16.mxu0 %v1488_v0  ;;  %1277 = vmatprep.subr.bf16.mxu1 %v1488_v0  ;;  %v1608_v18 = vld [vmem:[%s1838_s2] ss:$0 sm:$0xff]  ;;  %v1148_v53 = vld [vmem:[%s1837_s0 + $0x6] sm:$0x3]  ;;  %vm1128_vm7 = vcmask 1024  }
   0x7   :  { %1270 = vmatpush3.bf16.msra.mxu0 %v1540_v2  ;;  %1278 = vmatpush3.bf16.msra.mxu1 %v1561_v5 }
   0x8   :  { %1287 = vmatprep.subr.bf16.mxu0 %v1488_v0  ;;  %1279 = vmatprep.subr.bf16.mxu1 %v1488_v0 }
   0xa   :  { %1272 = vmatmul.mubr.bf16.vlgmr.msra.gmra.mrb[0].mxu0 %v1490_v3 }
   0xb   :  { %1288 = vmatpush3.bf16.msra.mxu0 %v1529_v1  ;;  %1291 = vmatprep.mubr.msk.bf16.mxu0 %vm1489_vm0, %v1488_v0 }
   0xc   :  { %1289 = vmatprep.subr.bf16.mxu0 %v1488_v0  ;;  %1280 = vmatpush3.bf16.msra.mxu1 %v1567_v6 }
   0xd   :  { %1281 = vmatprep.subr.bf16.mxu1 %v1488_v0 }
   0xf   :  { %1290 = vmatpush3.bf16.msra.mxu0 %v1540_v2 }
  0x10   :  { %1295 = vmatprep.subr.bf16.mxu0 %v1488_v0  ;;  %1282 = vmatpush3.bf16.msra.mxu1 %v1574_v7 }
  0x11   :  { %1315 = vmatprep.subr.bf16.mxu1 %v1488_v0 }
  0xdd   :  { %v93_v9 = vpop.f32.mrb[0].mxu0 }
  0xde   :  { %v99_v10 = vadd.f32 %v93_v9, %v42_v8  ;;  %v1273_v11 = vpop.f32.mrb[1].mxu0 }
  0xdf   :  { %v96_v12 = vpop.f32.mrb[2].mxu0 }
  0xe0   :  { %1456 = vtanh.f32 %v99_v10  ;;  %v1274_v13 = vpop.f32.mrb[3].mxu0  ;;  %v1151_v10 = vld [vmem:[%s1837_s0 + $0x8] sm:$0x3] }
  0xea   :  { %v1457_v14 = vpop.eup %1456 }
  0xeb   :  { %v177_v15 = vpack.c.bf16 %v1457_v14, %v1457_v14  ;;  %v101_v16 = vsel %vm55_vm1, %v1457_v14, 0.0 }
  0xec   :  { %v102_v17 = vpack.c.bf16 %v101_v16, %v101_v16 }
  0xed   :  { %1292 = vmatmul.mubr.msk.bf16.vlgmr.msra.gmra.mrb[4].mxu0 %vm55_vm1, %v177_v15 }
  0xee   :  { %1284 = vmatmul.mubr.msk.bf16.vlgmr.msra.gmra.mrb[0].mxu1 %vm127_vm2, %v102_v17  ;;  %1296 = vmatpush3.bf16.msra.mxu0 %v1554_v4 }
  0xef   :  { %1297 = vmatprep.subr.bf16.mxu0 %v1488_v0  ;;  %1303 = vmatprep.mubr.msk.bf16.mxu0 %vm1489_vm0, %v1488_v0 }
  0xf0   :  { %1316 = vmatpush3.bf16.msra.mxu1 %v1554_v4  ;;  %1323 = vmatprep.mubr.msk.bf16.mxu1 %vm1489_vm0, %v1488_v0 }
  0xf1   :  { %1317 = vmatprep.subr.bf16.mxu1 %v1488_v0 }
  0xf2   :  { %1298 = vmatpush3.bf16.msra.mxu0 %v1561_v5 }
  0xf3   :  { %1299 = vmatprep.subr.bf16.mxu0 %v1488_v0 }
  0xf4   :  { %1318 = vmatpush3.bf16.msra.mxu1 %v1561_v5 }
  0xf5   :  { %1319 = vmatprep.subr.bf16.mxu1 %v1488_v0 }
  0xf6   :  { %1300 = vmatpush3.bf16.msra.mxu0 %v1567_v6 }
  0xf7   :  { %1301 = vmatprep.subr.bf16.mxu0 %v1488_v0 }
  0xf8   :  { %1320 = vmatpush3.bf16.msra.mxu1 %v1567_v6 }
  0xf9   :  { %1321 = vmatprep.subr.bf16.mxu1 %v1488_v0 }
  0xfa   :  { %1302 = vmatpush3.bf16.msra.mxu0 %v1574_v7 }
  0xfb   :  { %1307 = vmatprep.subr.bf16.mxu0 %v1488_v0 }
  0xfc   :  { %1322 = vmatpush3.bf16.msra.mxu1 %v1574_v7 }
  0xfd   :  { %1347 = vmatprep.subr.bf16.mxu1 %v1488_v0 }
 0x1c0   :  { %v215_v19 = vpop.f32.mrb[4].mxu0 }
 0x1c1   :  { %v165_v20 = vpop.f32.mrb[0].mxu1  ;;  %v1293_v21 = vpop.f32.mrb[5].mxu0  ;;  %v221_v30 = vadd.f32 %v1142_v29, %v215_v19 }
 0x1c2   :  { %v171_v22 = vadd.f32 %v1608_v18, %v165_v20  ;;  %v1285_v23 = vpop.f32.mrb[1].mxu1  ;;  %v218_v24 = vpop.f32.mrb[6].mxu0 }
 0x1c3   :  { %v168_v25 = vpop.f32.mrb[2].mxu1  ;;  %v1294_v26 = vpop.f32.mrb[7].mxu0 }
 0x1c4   :  { %1458 = vtanh.f32 %v171_v22  ;;  %v1286_v27 = vpop.f32.mrb[3].mxu1 }
 0x1c5   :  { %1460 = vtanh.f32 %v221_v30 }
 0x1ce   :  { %v1459_v28 = vpop.eup %1458 }
 0x1cf   :  { %224 = vrot.lane.b32.xlu0 %v1459_v28, %s1491_s8  ;;  %174 = vst.msk [vmem:[#allocation2] sm:$0x3] %vm173_vm3, %v1459_v28  ;;  %v1461_v31 = vpop.eup %1460 }
 0x1d0   :  { %v289_v35 = vpack.c.bf16 %v1461_v31, %v1461_v31 }
 0x241   :  { %v225_v32 = vpop.permute.xlu0 %224 }
 0x242   :  { %v227_v33 = vsel %vm55_vm1, %v1461_v31, %v225_v32  ;;  %v1154_v32 = vld [vmem:[%s1837_s0 + $0xa] sm:$0x3] }
 0x243   :  { %v228_v34 = vpack.c.bf16 %v227_v33, %v227_v33 }
 0x245   :  { %1304 = vmatmul.mubr.msk.bf16.vlgmr.msra.gmra.mrb[8].mxu0 %vm127_vm2, %v228_v34 }
 0x246   :  { %1308 = vmatpush3.bf16.msra.mxu0 %v1529_v1  ;;  %1311 = vmatprep.mubr.msk.bf16.mxu0 %vm1489_vm0, %v1488_v0 }
 0x247   :  { %1309 = vmatprep.subr.bf16.mxu0 %v1488_v0 }
 0x24a   :  { %1310 = vmatpush3.bf16.msra.mxu0 %v1540_v2 }
 0x24b   :  { %1327 = vmatprep.subr.bf16.mxu0 %v1488_v0 }
 0x24d   :  { %1312 = vmatmul.mubr.msk.bf16.vlgmr.msra.gmra.mrb[12].mxu0 %vm55_vm1, %v289_v35 }
 0x24e   :  { %1328 = vmatpush3.bf16.msra.mxu0 %v1529_v1  ;;  %1331 = vmatprep.mubr.msk.bf16.mxu0 %vm1489_vm0, %v1488_v0 }
 0x24f   :  { %1329 = vmatprep.subr.bf16.mxu0 %v1488_v0 }
 0x252   :  { %1330 = vmatpush3.bf16.msra.mxu0 %v1540_v2 }
 0x253   :  { %1335 = vmatprep.subr.bf16.mxu0 %v1488_v0 }
 0x318   :  { %v266_v36 = vpop.f32.mrb[8].mxu0 }
 0x319   :  { %v272_v37 = vadd.f32 %v1608_v18, %v266_v36  ;;  %v1305_v38 = vpop.f32.mrb[9].mxu0 }
 0x31a   :  { %v269_v39 = vpop.f32.mrb[10].mxu0 }
 0x31b   :  { %1462 = vtanh.f32 %v272_v37  ;;  %v1306_v40 = vpop.f32.mrb[11].mxu0 }
 0x320   :  { %v327_v42 = vpop.f32.mrb[12].mxu0 }
 0x321   :  { %v333_v43 = vadd.f32 %v1145_v41, %v327_v42  ;;  %v1313_v44 = vpop.f32.mrb[13].mxu0 }
 0x322   :  { %v330_v45 = vpop.f32.mrb[14].mxu0 }
 0x323   :  { %1464 = vtanh.f32 %v333_v43  ;;  %v1314_v46 = vpop.f32.mrb[15].mxu0 }
 0x325   :  { %v1635_v47 = vpop.eup %1462 }
 0x326   :  { %335 = vrot.lane.b32.xlu0 %v1635_v47, %s1491_s8 }
 0x32d   :  { %v1465_v48 = vpop.eup %1464 }
 0x32e   :  { %v400_v49 = vpack.c.bf16 %v1465_v48, %v1465_v48 }
 0x330   :  { %1332 = vmatmul.mubr.msk.bf16.vlgmr.msra.gmra.mrb[16].mxu0 %vm55_vm1, %v400_v49 }
 0x331   :  { %1336 = vmatpush3.bf16.msra.mxu0 %v1554_v4  ;;  %1343 = vmatprep.mubr.msk.bf16.mxu0 %vm1489_vm0, %v1488_v0 }
 0x332   :  { %1337 = vmatprep.subr.bf16.mxu0 %v1488_v0 }
 0x335   :  { %1338 = vmatpush3.bf16.msra.mxu0 %v1561_v5 }
 0x336   :  { %1339 = vmatprep.subr.bf16.mxu0 %v1488_v0 }
 0x339   :  { %1340 = vmatpush3.bf16.msra.mxu0 %v1567_v6 }
 0x33a   :  { %1341 = vmatprep.subr.bf16.mxu0 %v1488_v0 }
 0x33d   :  { %1342 = vmatpush3.bf16.msra.mxu0 %v1574_v7 }
 0x33e   :  { %1367 = vmatprep.subr.bf16.mxu0 %v1488_v0 }
 0x398   :  { %v336_v50 = vpop.permute.xlu0 %335 }
 0x399   :  { %v338_v51 = vsel %vm55_vm1, %v1465_v48, %v336_v50  ;;  %v1157_v50 = vld [vmem:[%s1837_s0 + $0xc] sm:$0x3] }
 0x39a   :  { %v339_v52 = vpack.c.bf16 %v338_v51, %v338_v51 }
 0x39c   :  { %1324 = vmatmul.mubr.msk.bf16.vlgmr.msra.gmra.mrb[4].mxu1 %vm127_vm2, %v339_v52 }
 0x39d   :  { %1348 = vmatpush3.bf16.msra.mxu1 %v1529_v1  ;;  %1351 = vmatprep.mubr.msk.bf16.mxu1 %vm1489_vm0, %v1488_v0 }
 0x39e   :  { %1349 = vmatprep.subr.bf16.mxu1 %v1488_v0 }
 0x3a1   :  { %1350 = vmatpush3.bf16.msra.mxu1 %v1540_v2 }
 0x3a2   :  { %1355 = vmatprep.subr.bf16.mxu1 %v1488_v0 }
 0x403   :  { %v438_v54 = vpop.f32.mrb[16].mxu0 }
 0x404   :  { %v444_v55 = vadd.f32 %v1148_v53, %v438_v54  ;;  %v1333_v56 = vpop.f32.mrb[17].mxu0 }
 0x405   :  { %v441_v57 = vpop.f32.mrb[18].mxu0 }
 0x406   :  { %1466 = vtanh.f32 %v444_v55  ;;  %v1334_v58 = vpop.f32.mrb[19].mxu0 }
 0x410   :  { %v1467_v59 = vpop.eup %1466 }
 0x411   :  { %v511_v60 = vpack.c.bf16 %v1467_v59, %v1467_v59 }
 0x413   :  { %1352 = vmatmul.mubr.msk.bf16.vlgmr.msra.gmra.mrb[8].mxu1 %vm55_vm1, %v511_v60 }
 0x414   :  { %1356 = vmatpush3.bf16.msra.mxu1 %v1554_v4  ;;  %1363 = vmatprep.mubr.msk.bf16.mxu1 %vm1489_vm0, %v1488_v0 }
 0x415   :  { %1357 = vmatprep.subr.bf16.mxu1 %v1488_v0 }
 0x418   :  { %1358 = vmatpush3.bf16.msra.mxu1 %v1561_v5 }
 0x419   :  { %1359 = vmatprep.subr.bf16.mxu1 %v1488_v0 }
 0x41c   :  { %1360 = vmatpush3.bf16.msra.mxu1 %v1567_v6 }
 0x41d   :  { %1361 = vmatprep.subr.bf16.mxu1 %v1488_v0 }
 0x420   :  { %1362 = vmatpush3.bf16.msra.mxu1 %v1574_v7 }
 0x421   :  { %1387 = vmatprep.subr.bf16.mxu1 %v1488_v0 }
 0x46f   :  { %v377_v61 = vpop.f32.mrb[4].mxu1 }
 0x470   :  { %v383_v62 = vadd.f32 %v1608_v18, %v377_v61  ;;  %v1325_v63 = vpop.f32.mrb[5].mxu1  ;;  %v278_v61 = vlaneseq }
 0x471   :  { %v380_v3 = vpop.f32.mrb[6].mxu1 }
 0x472   :  { %1468 = vtanh.f32 %v383_v62  ;;  %v1326_v8 = vpop.f32.mrb[7].mxu1  ;;  %v279_v63 = vshrl.u32 %v278_v61, 7 }
 0x47c   :  { %v1673_v9 = vpop.eup %1468 }
 0x47d   :  { %446 = vrot.lane.b32.xlu1 %v1673_v9, %s1491_s8 }
 0x4e6   :  { %v549_v11 = vpop.f32.mrb[8].mxu1 }
 0x4e7   :  { %v1353_v12 = vpop.f32.mrb[9].mxu1  ;;  %v555_v13 = vadd.f32 %v1151_v10, %v549_v11 }
 0x4e8   :  { %v552_v14 = vpop.f32.mrb[10].mxu1 }
 0x4e9   :  { %v1354_v15 = vpop.f32.mrb[11].mxu1  ;;  %1470 = vtanh.f32 %v555_v13 }
 0x4ef   :  { %v447_v16 = vpop.permute.xlu1 %446 }
 0x4f0   :  { %v449_v17 = vsel %vm55_vm1, %v1467_v59, %v447_v16  ;;  %v1492_v59 = vmov 1983009808  }
 0x4f1   :  { %v450_v19 = vpack.c.bf16 %v449_v17, %v449_v17  ;;  %v276_v60 = vunpack.c.l.s4 %v1492_v59  ;;  %v10_v59 = vstv %s1840_s4 }
 0x4f2   :  { %11 = vst [vmem:[#allocation3] sm:$0x1] %v10_v59 }
 0x4f3   :  { %1344 = vmatmul.mubr.msk.bf16.vlgmr.msra.gmra.mrb[20].mxu0 %vm127_vm2, %v450_v19  ;;  %v1471_v20 = vpop.eup %1470 }
 0x4f4   :  { %1368 = vmatpush3.bf16.msra.mxu0 %v1529_v1  ;;  %1371 = vmatprep.mubr.msk.bf16.mxu0 %vm1489_vm0, %v1488_v0  ;;  %v610_v21 = vpack.c.bf16 %v1471_v20, %v1471_v20 }
 0x4f5   :  { %1369 = vmatprep.subr.bf16.mxu0 %v1488_v0 }
 0x4f8   :  { %1370 = vmatpush3.bf16.msra.mxu0 %v1540_v2 }
 0x4f9   :  { %1375 = vmatprep.subr.bf16.mxu0 %v1488_v0  ;;  %v1164_v61 = vld [vmem:[#allocation3] ss:$0 sm:$0xff] }
 0x4fb   :  { %1372 = vmatmul.mubr.msk.bf16.vlgmr.msra.gmra.mrb[24].mxu0 %vm55_vm1, %v610_v21 }
 0x4fc   :  { %1376 = vmatpush3.bf16.msra.mxu0 %v1554_v4  ;;  %1383 = vmatprep.mubr.msk.bf16.mxu0 %vm1489_vm0, %v1488_v0 }
 0x4fd   :  { %1377 = vmatprep.subr.bf16.mxu0 %v1488_v0 }
 0x500   :  { %1378 = vmatpush3.bf16.msra.mxu0 %v1561_v5 }
 0x501   :  { %1379 = vmatprep.subr.bf16.mxu0 %v1488_v0 }
 0x504   :  { %1380 = vmatpush3.bf16.msra.mxu0 %v1567_v6 }
 0x505   :  { %1381 = vmatprep.subr.bf16.mxu0 %v1488_v0 }
 0x508   :  { %1382 = vmatpush3.bf16.msra.mxu0 %v1574_v7 }
 0x509   :  { %1407 = vmatprep.subr.bf16.mxu0 %v1488_v0 }
 0x5c6   :  { %v488_v22 = vpop.f32.mrb[20].mxu0 }
 0x5c7   :  { %v494_v23 = vadd.f32 %v1608_v18, %v488_v22  ;;  %v1345_v24 = vpop.f32.mrb[21].mxu0 }
 0x5c8   :  { %v491_v25 = vpop.f32.mrb[22].mxu0 }
 0x5c9   :  { %1472 = vtanh.f32 %v494_v23  ;;  %v1346_v26 = vpop.f32.mrb[23].mxu0 }
 0x5ca   :  { %v1160_v26 = vld [vmem:[%s1837_s0 + $0xe] sm:$0x3] }
 0x5ce   :  { %v648_v27 = vpop.f32.mrb[24].mxu0 }
 0x5cf   :  { %v1373_v28 = vpop.f32.mrb[25].mxu0  ;;  %v654_v33 = vadd.f32 %v1154_v32, %v648_v27 }
 0x5d0   :  { %v651_v29 = vpop.f32.mrb[26].mxu0 }
 0x5d1   :  { %v1374_v30 = vpop.f32.mrb[27].mxu0  ;;  %1474 = vtanh.f32 %v654_v33 }
 0x5d3   :  { %v1700_v31 = vpop.eup %1472 }
 0x5d4   :  { %557 = vrot.lane.b32.xlu1 %v1700_v31, %s1491_s8 }
 0x5db   :  { %v1475_v37 = vpop.eup %1474 }
 0x5dc   :  { %v721_v38 = vpack.c.bf16 %v1475_v37, %v1475_v37 }
 0x646   :  { %v558_v34 = vpop.permute.xlu1 %557 }
 0x647   :  { %v560_v35 = vsel %vm55_vm1, %v1471_v20, %v558_v34  ;;  %v1440_v34 = vld [vmem:[%s1839_s3 + $0x40] sm:$0xff]  }
 0x648   :  { %v561_v36 = vpack.c.bf16 %v560_v35, %v560_v35  ;;  %v1441_v35 = vld [vmem:[%s1839_s3] sm:$0xff]  }
 0x64a   :  { %1364 = vmatmul.mubr.msk.bf16.vlgmr.msra.gmra.mrb[12].mxu1 %vm127_vm2, %v561_v36  ;;  %v1442_v36 = vld [vmem:[%s1839_s3 + $0x48] sm:$0xff]  }
 0x64b   :  { %1388 = vmatpush3.bf16.msra.mxu1 %v1529_v1  ;;  %1391 = vmatprep.mubr.msk.bf16.mxu1 %vm1489_vm0, %v1488_v0 }
 0x64c   :  { %1389 = vmatprep.subr.bf16.mxu1 %v1488_v0 }
 0x64f   :  { %1390 = vmatpush3.bf16.msra.mxu1 %v1540_v2 }
 0x650   :  { %1395 = vmatprep.subr.bf16.mxu1 %v1488_v0 }
 0x652   :  { %1392 = vmatmul.mubr.msk.bf16.vlgmr.msra.gmra.mrb[16].mxu1 %vm55_vm1, %v721_v38  ;;  %v1444_v38 = vld [vmem:[%s1839_s3 + $0x50] sm:$0xff]  }
 0x653   :  { %1396 = vmatpush3.bf16.msra.mxu1 %v1554_v4  ;;  %1403 = vmatprep.mubr.msk.bf16.mxu1 %vm1489_vm0, %v1488_v0 }
 0x654   :  { %1397 = vmatprep.subr.bf16.mxu1 %v1488_v0 }
 0x657   :  { %1398 = vmatpush3.bf16.msra.mxu1 %v1561_v5 }
 0x658   :  { %1399 = vmatprep.subr.bf16.mxu1 %v1488_v0 }
 0x65b   :  { %1400 = vmatpush3.bf16.msra.mxu1 %v1567_v6 }
 0x65c   :  { %1401 = vmatprep.subr.bf16.mxu1 %v1488_v0 }
 0x65f   :  { %1402 = vmatpush3.bf16.msra.mxu1 %v1574_v7 }
 0x660   :  { %1245 = vmatprep.subr.bf16.mxu1 %v1440_v34 }
 0x71d   :  { %v599_v39 = vpop.f32.mrb[12].mxu1 }
 0x71e   :  { %v605_v40 = vadd.f32 %v1608_v18, %v599_v39  ;;  %v1365_v41 = vpop.f32.mrb[13].mxu1  ;;  %v1445_v39 = vld [vmem:[%s1839_s3 + $0x10] sm:$0xff]  }
 0x71f   :  { %v602_v42 = vpop.f32.mrb[14].mxu1  ;;  %v1447_v41 = vld [vmem:[%s1839_s3 + $0x18] sm:$0xff]  }
 0x720   :  { %1476 = vtanh.f32 %v605_v40  ;;  %v1366_v43 = vpop.f32.mrb[15].mxu1  ;;  %v1446_v40 = vld [vmem:[%s1839_s3 + $0x58] sm:$0xff]   ;;  %v1448_v42 = vld [vmem:[%s1839_s3 + $0x60] sm:$0xff]  }
 0x721   :  { %v1449_v43 = vld [vmem:[%s1839_s3 + $0x20] sm:$0xff]  }
 0x725   :  { %v759_v44 = vpop.f32.mrb[16].mxu1 }
 0x726   :  { %v1393_v45 = vpop.f32.mrb[17].mxu1  ;;  %v765_v51 = vadd.f32 %v1157_v50, %v759_v44 }
 0x727   :  { %v762_v46 = vpop.f32.mrb[18].mxu1 }
 0x728   :  { %v1394_v48 = vpop.f32.mrb[19].mxu1  ;;  %1478 = vtanh.f32 %v765_v51  ;;  %v1451_v51 = vld [vmem:[%s1839_s3 + $0x28] sm:$0xff]  }
 0x72a   :  { %v1477_v49 = vpop.eup %1476 }
 0x72b   :  { %657 = vrot.lane.b32.xlu0 %v1477_v49, %s1491_s8  ;;  %607 = vst.msk [vmem:[#allocation2 + $0x2] sm:$0x3] %vm173_vm3, %v1477_v49  ;;  %v1450_v49 = vld [vmem:[%s1839_s3 + $0x68] sm:$0xff]  }
 0x732   :  { %v1479_v55 = vpop.eup %1478 }
 0x733   :  { %v831_v56 = vpack.c.bf16 %v1479_v55, %v1479_v55 }
 0x79d   :  { %v658_v52 = vpop.permute.xlu0 %657 }
 0x79e   :  { %v660_v53 = vsel %vm55_vm1, %v1475_v37, %v658_v52  ;;  %v1443_v37 = vld [vmem:[%s1839_s3 + $0x8] sm:$0xff]   ;;  %v1452_v52 = vld [vmem:[%s1839_s3 + $0x70] sm:$0xff]  }
 0x79f   :  { %v661_v54 = vpack.c.bf16 %v660_v53, %v660_v53  ;;  %v1454_v53 = vld [vmem:[%s1839_s3 + $0x78] sm:$0xff]  }
 0x7a1   :  { %1384 = vmatmul.mubr.msk.bf16.vlgmr.msra.gmra.mrb[28].mxu0 %vm127_vm2, %v661_v54  ;;  %v1455_v54 = vld [vmem:[%s1839_s3 + $0x38] sm:$0xff]  }
 0x7a2   :  { %1408 = vmatpush3.bf16.msra.mxu0 %v1529_v1  ;;  %1411 = vmatprep.mubr.msk.bf16.mxu0 %vm1489_vm0, %v1488_v0 }
 0x7a3   :  { %1409 = vmatprep.subr.bf16.mxu0 %v1488_v0 }
 0x7a6   :  { %1410 = vmatpush3.bf16.msra.mxu0 %v1540_v2 }
 0x7a7   :  { %1415 = vmatprep.subr.bf16.mxu0 %v1488_v0 }
 0x7a9   :  { %1412 = vmatmul.mubr.msk.bf16.vlgmr.msra.gmra.mrb[32].mxu0 %vm55_vm1, %v831_v56 }
 0x7aa   :  { %1416 = vmatpush3.bf16.msra.mxu0 %v1554_v4  ;;  %1423 = vmatprep.mubr.msk.bf16.mxu0 %vm1489_vm0, %v1488_v0 }
 0x7ab   :  { %1417 = vmatprep.subr.bf16.mxu0 %v1488_v0 }
 0x7ae   :  { %1418 = vmatpush3.bf16.msra.mxu0 %v1561_v5  ;;  %v277_v5 = vunpack.c.0.s8 %v276_v60 }
 0x7af   :  { %1419 = vmatprep.subr.bf16.mxu0 %v1488_v0 }
 0x7b0   :  { %v1750_v10 = vsub.s32 %v277_v5, %v279_v63 }
 0x7b2   :  { %1420 = vmatpush3.bf16.msra.mxu0 %v1567_v6  ;;  %v392_v11 = vrot.slane %v1673_v9, %v1750_v10  ;;  %v503_v12 = vrot.slane %v1700_v31, %v1750_v10 }
 0x7b3   :  { %1421 = vmatprep.subr.bf16.mxu0 %v1488_v0 }
 0x7b6   :  { %1422 = vmatpush3.bf16.msra.mxu0 %v1574_v7  ;;  %v281_v7 = vrot.slane %v1635_v47, %v1750_v10 }
 0x874   :  { %v699_v1 = vpop.f32.mrb[28].mxu0 }
 0x875   :  { %v705_v2 = vadd.f32 %v1608_v18, %v699_v1  ;;  %v1385_v57 = vpop.f32.mrb[29].mxu0 }
 0x876   :  { %v702_v4 = vpop.f32.mrb[30].mxu0 }
 0x877   :  { %1480 = vtanh.f32 %v705_v2  ;;  %v1386_v58 = vpop.f32.mrb[31].mxu0 }
 0x87c   :  { %v869_v62 = vpop.f32.mrb[32].mxu0 }
 0x87d   :  { %v1413_v3 = vpop.f32.mrb[33].mxu0  ;;  %v875_v27 = vadd.f32 %v1160_v26, %v869_v62 }
 0x87e   :  { %v872_v8 = vpop.f32.mrb[34].mxu0 }
 0x87f   :  { %v1414_v6 = vpop.f32.mrb[35].mxu0 }
 0x881   :  { %v1481_v0 = vpop.eup %1480 }
 0x882   :  { %767 = vrot.lane.b32.xlu1 %v1481_v0, %s1491_s8  ;;  %v714_v24 = vrot.slane %v1481_v0, %v1750_v10 }
 0x886   :  { %282 = vrot.lane.b32.xlu1 %v281_v7, %s1491_s8 }
 0x88a   :  { %393 = vrot.lane.b32.xlu1 %v392_v11, %s1493_s20 }
 0x88e   :  { %504 = vrot.lane.b32.xlu1 %v503_v12, %s1494_s21 }
 0x8f4   :  { %v768_v13 = vpop.permute.xlu1 %767 }
 0x8f5   :  { %v770_v14 = vsel %vm55_vm1, %v1479_v55, %v768_v13 }
 0x8f6   :  { %v771_v15 = vpack.c.bf16 %v770_v14, %v770_v14 }
 0x8f8   :  { %v283_v16 = vpop.permute.xlu1 %282  ;;  %1404 = vmatmul.mubr.msk.bf16.vlgmr.msra.gmra.mrb[20].mxu1 %vm127_vm2, %v771_v15 }
 0x8f9   :  { %286 = vst.msk [vmem:[#allocation2] sm:$0x3] %vm285_vm4, %v283_v16  ;;  %1246 = vmatpush3.bf16.msra.mxu1 %v1441_v35 }
 0x8fa   :  { %1247 = vmatprep.subr.bf16.mxu1 %v1442_v36 }
 0x8fc   :  { %v394_v47 = vpop.permute.xlu1 %393 }
 0x8fd   :  { %397 = vst.msk [vmem:[#allocation2] sm:$0x3] %vm396_vm5, %v394_v47  ;;  %1248 = vmatpush3.bf16.msra.mxu1 %v1443_v37 }
 0x8fe   :  { %1249 = vmatprep.subr.bf16.mxu1 %v1444_v38 }
 0x900   :  { %v505_v9 = vpop.permute.xlu1 %504 }
 0x901   :  { %508 = vst.msk [vmem:[#allocation2] sm:$0x3] %vm507_vm6, %v505_v9  ;;  %1250 = vmatpush3.bf16.msra.mxu1 %v1445_v39 }
 0x902   :  { %1251 = vmatprep.subr.bf16.mxu1 %v1446_v40 }
 0x905   :  { %1252 = vmatpush3.bf16.msra.mxu1 %v1447_v41 }
 0x906   :  { %1253 = vmatprep.subr.bf16.mxu1 %v1448_v42 }
 0x909   :  { %1254 = vmatpush3.bf16.msra.mxu1 %v1449_v43 }
 0x90a   :  { %1255 = vmatprep.subr.bf16.mxu1 %v1450_v49 }
 0x90d   :  { %1256 = vmatpush3.bf16.msra.mxu1 %v1451_v51 }
 0x90e   :  { %1257 = vmatprep.subr.bf16.mxu1 %v1452_v52 }
 0x9cb   :  { %v809_v17 = vpop.f32.mrb[20].mxu1 }
 0x9cc   :  { %v815_v19 = vadd.f32 %v1608_v18, %v809_v17  ;;  %v1405_v20 = vpop.f32.mrb[21].mxu1 }
 0x9cd   :  { %v812_v21 = vpop.f32.mrb[22].mxu1 }
 0x9ce   :  { %1482 = vtanh.f32 %v815_v19  ;;  %v1406_v22 = vpop.f32.mrb[23].mxu1 }
 0x9cf   :  { %1484 = vtanh.f32 %v875_v27 }
 0x9d8   :  { %v1483_v23 = vpop.eup %1482 }
 0x9d9   :  { %877 = vrot.lane.b32.xlu0 %v1483_v23, %s1491_s8  ;;  %v824_v25 = vrot.slane %v1483_v23, %v1750_v10  ;;  %v1485_v28 = vpop.eup %1484 }
 0x9dd   :  { %715 = vrot.lane.b32.xlu0 %v714_v24, %s1491_s8 }
 0x9e1   :  { %825 = vrot.lane.b32.xlu0 %v824_v25, %s1493_s20 }
 0xa4b   :  { %v878_v29 = vpop.permute.xlu0 %877 }
 0xa4c   :  { %v880_v30 = vsel %vm55_vm1, %v1485_v28, %v878_v29 }
 0xa4d   :  { %v881_v31 = vpack.c.bf16 %v880_v30, %v880_v30 }
 0xa4f   :  { %1424 = vmatmul.mubr.msk.bf16.vlgmr.msra.gmra.mrb[36].mxu0 %vm127_vm2, %v881_v31  ;;  %v716_v32 = vpop.permute.xlu0 %715 }
 0xa50   :  { %718 = vst.msk [vmem:[#allocation2 + $0x2] sm:$0x3] %vm285_vm4, %v716_v32 }
 0xa53   :  { %v826_v33 = vpop.permute.xlu0 %825 }
 0xa54   :  { %828 = vst.msk [vmem:[#allocation2 + $0x2] sm:$0x3] %vm396_vm5, %v826_v33 }
 0xb22   :  { %v919_v44 = vpop.f32.mrb[36].mxu0 }
 0xb23   :  { %v925_v45 = vadd.f32 %v1608_v18, %v919_v44  ;;  %v1425_v46 = vpop.f32.mrb[37].mxu0  ;;  %v1453_v18 = vld [vmem:[%s1839_s3 + $0x30] sm:$0xff]  }
 0xb24   :  { %v922_v48 = vpop.f32.mrb[38].mxu0  ;;  %1258 = vmatpush3.bf16.msra.mxu1 %v1453_v18 }
 0xb25   :  { %1486 = vtanh.f32 %v925_v45  ;;  %v1426_v50 = vpop.f32.mrb[39].mxu0  ;;  %1259 = vmatprep.subr.bf16.mxu1 %v1454_v53 }
 0xb28   :  { %1260 = vmatpush3.bf16.msra.mxu1 %v1455_v54 }
 0xb2f   :  { %v1487_v55 = vpop.eup %1486 }
 0xb30   :  { %v934_v56 = vrot.slane %v1487_v55, %v1750_v10 }
 0xb32   :  { %935 = vrot.lane.b32.xlu0 %v934_v56, %s1494_s21 }
 0xba4   :  { %v936_v1 = vpop.permute.xlu0 %935 }
 0xba5   :  { %938 = vst.msk [vmem:[#allocation2 + $0x2] sm:$0x3] %vm507_vm6, %v936_v1 }
 0xbac   :  { %v1163_v2 = vld.sshfl [vmem:[#allocation2] sm:$0x33 pattern:$0x76325410] }
 0xbad   :  { %v948_v57 = vcombine.high %v1163_v2, %v1163_v2  ;;  %v951_v58 = vpack.c.bf16 %v1163_v2, %v1163_v2 }
 0xbaf   :  { %v952_v4 = vpack.c.bf16 %v948_v57, %v948_v57 }
 0xbb1   :  { %1120 = vmatprep.mubr.bf16.mxu1 %v952_v4 }
 0xbb2   :  { %1121 = vmatmul.mubr.bf16.vlgmr.msra.gmra.mrb[24].mxu1 %v951_v58 }
 0xc85   :  { %v1261_v60 = vpop.f32.mrb[24].mxu1 }
 0xc86   :  { %v1262_v62 = vpop.f32.mrb[25].mxu1 }
 0xc87   :  { %v1263_v5 = vadd.f32 %v1262_v62, %v1261_v60  ;;  %v1264_v63 = vpop.f32.mrb[26].mxu1 }
 0xc88   :  { %v1265_v3 = vpop.f32.mrb[27].mxu1 }
 0xc89   :  { %v1123_v8 = vadd.f32 %v1263_v5, %v1164_v61 }
 0xc8b   :  { %1129 = vst.msk [vmem:[%s1841_s5] sm:$0x3] %vm1128_vm7, %v1123_v8 }

</bundles_post_ra>
